<compile_context>
chip_gen: v6e
topology: v6e:2x2x1
jax: 0.10.0
libtpu: 0.0.40
codegen_flags: <defaults>
</compile_context>

<pallas_src>
import functools

import jax
import jax.numpy as jnp
from jax import lax
from jax.experimental import pallas as pl
from jax.experimental.pallas import tpu as pltpu


def _cdiv(a, d):
    return -(-a // d)


def _round_up(a, d):
    return _cdiv(a, d) * d


def _plan(b, itemsize, block_rows=None):
    """Pick (tile_rows, n_tiles, tiles_per_core, use_diag_inputs, vmem_limit)."""
    try:
        vmem_cap = int(pltpu.get_tpu_info().vmem_capacity_bytes)
        if vmem_cap <= 0:
            raise ValueError("bad vmem capacity")
    except Exception:
        vmem_cap = 64 * 1024 * 1024          # conservative default (v7x per-core)
    vmem_limit = max(32 * 1024 * 1024,
                     min((vmem_cap * 3) // 4, 110 * 1024 * 1024))

    if block_rows is not None:
        tm = max(1, min(int(block_rows), b))
        if tm < b:
            tm = max(8, (tm // 8) * 8)       # 2nd-to-last block dim: 8-aligned
            if tm >= b:
                tm = b
    else:
        # Conservative per-row VMEM footprint: 2 inputs x 2 pipeline buffers +
        # 2 diag blocks x 2 buffers (bounded by tm <= B), in the native dtype,
        # plus ~4 f32 (tm, B) temporaries materialized inside the kernel.
        per_row = b * (8 * itemsize + 16)
        tm_cap = max(8, min(2048, vmem_limit // max(per_row, 1)))
        if tm_cap >= b:
            # Whole problem fits: still split the rows in two so a second
            # TensorCore (v7x) gets half the work (harmless 2-step loop on 1 TC).
            half = _round_up(_cdiv(b, 2), 128)
            tm = half if half < b else b
        elif tm_cap >= 128:
            tm = (tm_cap // 128) * 128       # 128-aligned rows => (tm, tm) diag
            nt0 = _cdiv(b, tm)               # blocks are legal BlockSpecs
            if nt0 % 2:                      # prefer an even tile count so the
                nt0 += 1                     # 2-way core split has no dummy step
                tm = _round_up(_cdiv(b, nt0), 128)
        else:
            # Huge B: cannot afford 128-row tiles; fall back to in-tile
            # iota-mask diagonal (selected statically below).
            align = max(8, 32 // itemsize)   # 8 f32 / 16 bf16 / 32 int8
            tm = max(align, (tm_cap // align) * align)

    nt = _cdiv(b, tm)                        # total row tiles
    tpc = _cdiv(nt, 2)                       # row tiles handled per core
    use_diag_in = (tm % 128 == 0) and (tm < b)
    return tm, nt, tpc, use_diag_in, vmem_limit


def _boostpro_loss_kernel(*refs, smooth, tm, b, nt, tpc, use_diag_in):
    if use_diag_in:
        s_ref, st_ref, ds_ref, dst_ref = refs[0], refs[1], refs[2], refs[3]
        k = 4
    else:
        s_ref, st_ref = refs[0], refs[1]
        ds_ref = dst_ref = None
        k = 2
    rowp_ref, colm_out, coll_out = refs[k], refs[k + 1], refs[k + 2]
    acc_ref, colm_sc, coll_sc = refs[k + 3], refs[k + 4], refs[k + 5]

    c = pl.program_id(0)                 # core-split axis ("parallel")
    i = pl.program_id(1)                 # this core's row tiles ("arbitrary")
    tile = c * tpc + i                   # global row-tile index

    ragged = (b % tm) != 0               # static (Python-level) switches
    has_dummy = (2 * tpc) != nt

    @pl.when(i == 0)
    def _init():
        acc_ref[0] = jnp.float32(0.0)
        colm_sc[...] = jnp.full_like(colm_sc, -jnp.inf)
        coll_sc[...] = jnp.zeros_like(coll_sc)

    def tile_update(masked):
        # Up-cast in-kernel; inputs stream through VMEM in their native dtype.
        s = (s_ref[...].astype(jnp.float32)
             - st_ref[...].astype(jnp.float32)) * smooth           # (tm, b)

        # ---- diagonal of this row block of S -----------------------------
        if use_diag_in:
            # Dedicated (tm, tm) block delivered by BlockSpec -> no (tm, B)
            # iota / compare / select work on the wide tile.
            dblk = (ds_ref[...].astype(jnp.float32)
                    - dst_ref[...].astype(jnp.float32)) * smooth   # (tm, tm)
            eye = (lax.broadcasted_iota(jnp.int32, (tm, tm), 0)
                   == lax.broadcasted_iota(jnp.int32, (tm, tm), 1))
            diag = jnp.sum(jnp.where(eye, dblk, 0.0), axis=-1, keepdims=True)
        else:
            # Fallback (tiny B or row tiles < 128): full-tile iota mask.
            r0 = tile * tm
            hit = (lax.broadcasted_iota(jnp.int32, (tm, b), 1)
                   == lax.broadcasted_iota(jnp.int32, (tm, b), 0) + r0)
            diag = jnp.sum(jnp.where(hit, s, 0.0), axis=-1, keepdims=True)

        # ---- row direction: per valid row, 2*S[i,i] - row_lse(S)[i] -------
        row_max = jnp.max(s, axis=-1, keepdims=True)
        row_lse = jnp.log(jnp.sum(jnp.exp(s - row_max), axis=-1,
                                  keepdims=True)) + row_max
        contrib = 2.0 * diag - row_lse                              # (tm, 1)
        if masked:                         # only the ragged last tile pays this
            rv = (lax.broadcasted_iota(jnp.int32, (tm, 1), 0) + tile * tm) < b
            contrib = jnp.where(rv, contrib, 0.0)
            s_col = jnp.where(rv, s, -jnp.inf)
        else:
            s_col = s
        acc_ref[0] += jnp.sum(contrib)

        # ---- column direction: online (flash-style) max / sum-of-exp ------
        m_old = colm_sc[...]                                        # (1, b)
        m_new = jnp.maximum(m_old, jnp.max(s_col, axis=0, keepdims=True))
        coll_sc[...] = (coll_sc[...] * jnp.exp(m_old - m_new)
                        + jnp.sum(jnp.exp(s_col - m_new), axis=0, keepdims=True))
        colm_sc[...] = m_new

    if ragged:
        @pl.when(tile < nt - 1)
        def _interior():
            tile_update(masked=False)

        @pl.when(tile == nt - 1)
        def _last():
            tile_update(masked=True)
    elif has_dummy:
        @pl.when(tile < nt)
        def _real():
            tile_update(masked=False)
    else:
        tile_update(masked=False)

    @pl.when(i == tpc - 1)
    def _fini():
        rowp_ref[...] = jnp.full(rowp_ref.shape, acc_ref[0], jnp.float32)
        colm_out[...] = colm_sc[...].reshape(colm_out.shape)
        coll_out[...] = coll_sc[...].reshape(coll_out.shape)


def boostpro_loss(scores, scores_t, smooth=10.0, block_rows=None):
    """Pallas TPU implementation of BoostproLoss.forward. Returns a scalar."""
    assert scores.shape == scores_t.shape
    assert scores.ndim == 2 and scores.shape[0] == scores.shape[1], (
        "scores must be a square [B, B] matrix")
    b = scores.shape[0]
    itemsize = jnp.dtype(scores.dtype).itemsize
    tm, nt, tpc, use_diag_in, vmem_limit = _plan(b, itemsize, block_rows)
    clamp = (2 * tpc) != nt            # core 1 may run one dummy (skipped) step

    def row_map(c, i):
        t = c * tpc + i
        if clamp:
            t = jnp.minimum(t, nt - 1)
        return (t, 0)

    def diag_map(c, i):
        t = c * tpc + i
        if clamp:
            t = jnp.minimum(t, nt - 1)
        return (t, t)

    in_specs = [pl.BlockSpec((tm, b), row_map),
                pl.BlockSpec((tm, b), row_map)]
    args = [scores, scores_t]
    if use_diag_in:
        in_specs += [pl.BlockSpec((tm, tm), diag_map),
                     pl.BlockSpec((tm, tm), diag_map)]
        args += [scores, scores_t]

    out_shape = (
        jax.ShapeDtypeStruct((2, 8, 128), jnp.float32),   # per-core row-term sum
        jax.ShapeDtypeStruct((2, 1, b), jnp.float32),     # per-core column max
        jax.ShapeDtypeStruct((2, 1, b), jnp.float32),     # per-core column sum-exp
    )
    out_specs = [
        pl.BlockSpec((1, 8, 128), lambda c, i: (c, 0, 0)),
        pl.BlockSpec((1, 1, b), lambda c, i: (c, 0, 0)),
        pl.BlockSpec((1, 1, b), lambda c, i: (c, 0, 0)),
    ]

    grid_spec = pltpu.PrefetchScalarGridSpec(
        num_scalar_prefetch=0,
        grid=(2, tpc),
        in_specs=in_specs,
        out_specs=out_specs,
        scratch_shapes=[
            pltpu.SMEM((1,), jnp.float32),        # running row-term partial
            pltpu.VMEM((1, b), jnp.float32),      # online column max
            pltpu.VMEM((1, b), jnp.float32),      # online column sum of exp
        ],
    )

    kernel = functools.partial(
        _boostpro_loss_kernel, smooth=float(smooth), tm=tm, b=b, nt=nt, tpc=tpc,
        use_diag_in=use_diag_in)

    rowp, colm, coll = pl.pallas_call(
        kernel,
        out_shape=out_shape,
        grid_spec=grid_spec,
        compiler_params=pltpu.CompilerParams(
            dimension_semantics=("parallel", "arbitrary"),
            vmem_limit_bytes=int(vmem_limit),
        ),
    )(*args)

    # Tiny O(B) epilogue (plain XLA): merge the two per-core partials.
    rp = rowp[:, 0, 0]                                     # (2,)
    cm = colm[:, 0, :]                                     # (2, B) column max
    cl = coll[:, 0, :]                                     # (2, B) column sum-exp
    m = jnp.maximum(cm[0], cm[1])
    col_lse_sum = jnp.sum(m + jnp.log(cl[0] * jnp.exp(cm[0] - m)
                                      + cl[1] * jnp.exp(cm[1] - m)))
    return -(rp[0] + rp[1] - col_lse_sum) / jnp.float32(b)


def _boostpro_loss_ref(scores, scores_t, smooth=10.0):
    """Pure-JAX reference mirroring the PyTorch module (for verification)."""
    s_sub = scores.astype(jnp.float32) - scores_t.astype(jnp.float32)
    b = scores.shape[0]
    eye = jnp.eye(b, dtype=jnp.float32)
    logp_v2t = jax.nn.log_softmax(smooth * s_sub, axis=-1)
    logp_t2v = jax.nn.log_softmax(smooth * s_sub.T, axis=-1)
    v2t = -jnp.sum(eye * logp_v2t) / b
    t2v = -jnp.sum(eye * logp_t2v) / b
    return v2t + t2v


if __name__ == "__main__":
    key = jax.random.PRNGKey(0)
    k1, k2, k3, k4, k5, k6 = jax.random.split(key, 6)

    # Test 1: tiny single-tile problem (exercises the dummy second-core step).
    B = 8
    s = jax.random.normal(k1, (B, B), dtype=jnp.float32)
    st = jax.random.normal(k2, (B, B), dtype=jnp.float32)
    got = jax.block_until_ready(boostpro_loss(s, st, smooth=10.0))
    want = jax.block_until_ready(_boostpro_loss_ref(s, st, smooth=10.0))
    assert jnp.allclose(got, want, rtol=1e-5, atol=1e-4), (got, want)

    # Test 2: multi-tile grid, ragged last tile, iota-mask diagonal fallback.
    B = 24
    s = jax.random.normal(k3, (B, B), dtype=jnp.float32)
    st = jax.random.normal(k4, (B, B), dtype=jnp.float32)
    got = jax.block_until_ready(boostpro_loss(s, st, smooth=10.0, block_rows=16))
    want = jax.block_until_ready(_boostpro_loss_ref(s, st, smooth=10.0))
    assert jnp.allclose(got, want, rtol=1e-5, atol=1e-4), (got, want)

    # Test 3: bf16 inputs, 128-row tiles -> BlockSpec'd diagonal blocks, ragged
    # last tile, in-kernel up-cast (the large-B production configuration).
    B = 160
    s = jax.random.normal(k5, (B, B), dtype=jnp.float32).astype(jnp.bfloat16)
    st = jax.random.normal(k6, (B, B), dtype=jnp.float32).astype(jnp.bfloat16)
    got = jax.block_until_ready(boostpro_loss(s, st, smooth=10.0, block_rows=128))
    want = jax.block_until_ready(_boostpro_loss_ref(s, st, smooth=10.0))
    assert jnp.allclose(got, want, rtol=1e-4, atol=1e-3), (got, want)

    # Test 4: default heuristic tiling, even 2-way core split, no ragged tile.
    B = 256
    s = jax.random.normal(k1, (B, B), dtype=jnp.float32)
    st = jax.random.normal(k2, (B, B), dtype=jnp.float32)
    got = jax.block_until_ready(boostpro_loss(s, st, smooth=10.0))
    want = jax.block_until_ready(_boostpro_loss_ref(s, st, smooth=10.0))
    assert jnp.allclose(got, want, rtol=1e-5, atol=1e-4), (got, want)

    print("KERNEL_OK")
</pallas_src>

<mosaic_0001>
module attributes {stable_mosaic.version = 11 : i64} {
  func.func @_boostpro_loss_kernel(%arg0: i32, %arg1: i32, %arg2: memref<8x8xf32, #tpu.memory_space<vmem>>, %arg3: memref<8x8xf32, #tpu.memory_space<vmem>>, %arg4: memref<1x8x128xf32, #tpu.memory_space<vmem>>, %arg5: memref<1x1x8xf32, #tpu.memory_space<vmem>>, %arg6: memref<1x1x8xf32, #tpu.memory_space<vmem>>, %arg7: memref<1xf32, #tpu.memory_space<smem>>, %arg8: memref<1x8xf32, #tpu.memory_space<vmem>>, %arg9: memref<1x8xf32, #tpu.memory_space<vmem>>) attributes {dimension_semantics = [#tpu.dimension_semantics<parallel>, #tpu.dimension_semantics<arbitrary>], iteration_bounds = array<i64: 2, 1>, scalar_prefetch = 0 : i64, scratch_operands = 3 : i64, tpu.core_type = #tpu.core_type<tc>, window_params = [{transform_indices = @transform_0, window_bounds = array<i64: 8, 8>}, {transform_indices = @transform_1, window_bounds = array<i64: 8, 8>}, {transform_indices = @transform_2, window_bounds = array<i64: 1, 8, 128>}, {transform_indices = @transform_3, window_bounds = array<i64: 1, 1, 8>}, {transform_indices = @transform_4, window_bounds = array<i64: 1, 1, 8>}]} {
    %c1_i32 = arith.constant 1 : i32
    %0 = arith.muli %arg0, %c1_i32 : i32
    %1 = arith.addi %0, %arg1 : i32
    %c0_i32 = arith.constant 0 : i32
    %2 = arith.cmpi eq, %arg1, %c0_i32 : i32
    %3 = arith.extui %2 : i1 to i32
    %c0_i32_0 = arith.constant 0 : i32
    %4 = arith.cmpi ne, %3, %c0_i32_0 : i32
    scf.if %4 {
      %cst = arith.constant 0.000000e+00 : f32
      %c0 = arith.constant 0 : index
      %11 = memref.load %arg7[%c0] : memref<1xf32, #tpu.memory_space<smem>>
      memref.store %cst, %arg7[%c0] : memref<1xf32, #tpu.memory_space<smem>>
      %cst_5 = arith.constant 0xFF800000 : f32
      %12 = vector.broadcast %cst_5 : f32 to vector<1x8xf32>
      %c0_6 = arith.constant 0 : index
      %c0_7 = arith.constant 0 : index
      %13 = vector.load %arg8[%c0_6, %c0_7] : memref<1x8xf32, #tpu.memory_space<vmem>>, vector<1x8xf32>
      tpu.vector_store %arg8[%c0_6, %c0_7], %12 {strides = array<i32>} : memref<1x8xf32, #tpu.memory_space<vmem>>, vector<1x8xf32>,
      %cst_8 = arith.constant 0.000000e+00 : f32
      %14 = vector.broadcast %cst_8 : f32 to vector<1x8xf32>
      %c0_9 = arith.constant 0 : index
      %c0_10 = arith.constant 0 : index
      %15 = vector.load %arg9[%c0_9, %c0_10] : memref<1x8xf32, #tpu.memory_space<vmem>>, vector<1x8xf32>
      tpu.vector_store %arg9[%c0_9, %c0_10], %14 {strides = array<i32>} : memref<1x8xf32, #tpu.memory_space<vmem>>, vector<1x8xf32>,
    } else {
    }
    %c1_i32_1 = arith.constant 1 : i32
    %5 = arith.cmpi slt, %1, %c1_i32_1 : i32
    %6 = arith.extui %5 : i1 to i32
    %c0_i32_2 = arith.constant 0 : i32
    %7 = arith.cmpi ne, %6, %c0_i32_2 : i32
    scf.if %7 {
      %c0 = arith.constant 0 : index
      %c0_5 = arith.constant 0 : index
      %11 = vector.load %arg2[%c0, %c0_5] : memref<8x8xf32, #tpu.memory_space<vmem>>, vector<8x8xf32>
      %c0_6 = arith.constant 0 : index
      %c0_7 = arith.constant 0 : index
      %12 = vector.load %arg3[%c0_6, %c0_7] : memref<8x8xf32, #tpu.memory_space<vmem>>, vector<8x8xf32>
      %13 = arith.subf %11, %12 : vector<8x8xf32>
      %cst = arith.constant 1.000000e+01 : f32
      %14 = vector.broadcast %cst : f32 to vector<8x8xf32>
      %15 = arith.mulf %13, %14 : vector<8x8xf32>
      %c8_i32 = arith.constant 8 : i32
      %16 = arith.muli %1, %c8_i32 : i32
      %17 = tpu.iota {dimensions = array<i32: 1>} : vector<8x8xi32>
      %18 = tpu.iota {dimensions = array<i32: 0>} : vector<8x8xi32>
      %19 = vector.broadcast %16 : i32 to vector<8x8xi32>
      %20 = arith.addi %18, %19 : vector<8x8xi32>
      %21 = arith.cmpi eq, %17, %20 : vector<8x8xi32>
      %cst_8 = arith.constant 0.000000e+00 : f32
      %22 = vector.broadcast %cst_8 : f32 to vector<8x8xf32>
      %23 = arith.select %21, %15, %22 : vector<8x8xi1>, vector<8x8xf32>
      %cst_9 = arith.constant dense<0.000000e+00> : vector<8xf32>
      %24 = vector.multi_reduction <add>, %23, %cst_9 [1] : vector<8x8xf32> to vector<8xf32>
      %25 = vector.shape_cast %24 : vector<8xf32> to vector<8x1xf32>
      %cst_10 = arith.constant dense<0xFF800000> : vector<8xf32>
      %26 = vector.multi_reduction <maximumf>, %15, %cst_10 [1] : vector<8x8xf32> to vector<8xf32>
      %27 = vector.shape_cast %26 : vector<8xf32> to vector<8x1xf32>
      %28 = vector.broadcast %27 : vector<8x1xf32> to vector<8x8xf32>
      %29 = arith.subf %15, %28 : vector<8x8xf32>
      %30 = math.exp %29 : vector<8x8xf32>
      %cst_11 = arith.constant dense<0.000000e+00> : vector<8xf32>
      %31 = vector.multi_reduction <add>, %30, %cst_11 [1] : vector<8x8xf32> to vector<8xf32>
      %32 = vector.shape_cast %31 : vector<8xf32> to vector<8x1xf32>
      %33 = math.log %32 : vector<8x1xf32>
      %34 = arith.addf %33, %27 : vector<8x1xf32>
      %cst_12 = arith.constant 2.000000e+00 : f32
      %35 = vector.broadcast %cst_12 : f32 to vector<8x1xf32>
      %36 = arith.mulf %35, %25 : vector<8x1xf32>
      %37 = arith.subf %36, %34 : vector<8x1xf32>
      %c0_13 = arith.constant 0 : index
      %38 = memref.load %arg7[%c0_13] : memref<1xf32, #tpu.memory_space<smem>>
      %39 = vector.shape_cast %37 : vector<8x1xf32> to vector<1x8x1xf32>
      %cst_14 = arith.constant dense<0.000000e+00> : vector<1xf32>
      %40 = vector.multi_reduction <add>, %39, %cst_14 [1, 2] : vector<1x8x1xf32> to vector<1xf32>
      %41 = vector.shape_cast %40 : vector<1xf32> to vector<1x1x1xf32>
      %42 = vector.extract %41[0, 0, 0] : f32 from vector<1x1x1xf32>
      %43 = arith.addf %38, %42 : f32
      %c0_15 = arith.constant 0 : index
      %44 = memref.load %arg7[%c0_15] : memref<1xf32, #tpu.memory_space<smem>>
      memref.store %43, %arg7[%c0_15] : memref<1xf32, #tpu.memory_space<smem>>
      %c0_16 = arith.constant 0 : index
      %c0_17 = arith.constant 0 : index
      %45 = vector.load %arg8[%c0_16, %c0_17] : memref<1x8xf32, #tpu.memory_space<vmem>>, vector<1x8xf32>
      %cst_18 = arith.constant dense<0xFF800000> : vector<8xf32>
      %46 = vector.multi_reduction <maximumf>, %15, %cst_18 [0] : vector<8x8xf32> to vector<8xf32>
      %47 = vector.shape_cast %46 : vector<8xf32> to vector<1x8xf32>
      %48 = arith.maximumf %45, %47 : vector<1x8xf32>
      %c0_19 = arith.constant 0 : index
      %c0_20 = arith.constant 0 : index
      %49 = vector.load %arg9[%c0_19, %c0_20] : memref<1x8xf32, #tpu.memory_space<vmem>>, vector<1x8xf32>
      %50 = arith.subf %45, %48 : vector<1x8xf32>
      %51 = math.exp %50 : vector<1x8xf32>
      %52 = arith.mulf %49, %51 : vector<1x8xf32>
      %53 = vector.broadcast %48 : vector<1x8xf32> to vector<8x8xf32>
      %54 = arith.subf %15, %53 : vector<8x8xf32>
      %55 = math.exp %54 : vector<8x8xf32>
      %cst_21 = arith.constant dense<0.000000e+00> : vector<8xf32>
      %56 = vector.multi_reduction <add>, %55, %cst_21 [0] : vector<8x8xf32> to vector<8xf32>
      %57 = vector.shape_cast %56 : vector<8xf32> to vector<1x8xf32>
      %58 = arith.addf %52, %57 : vector<1x8xf32>
      %c0_22 = arith.constant 0 : index
      %c0_23 = arith.constant 0 : index
      %59 = vector.load %arg9[%c0_22, %c0_23] : memref<1x8xf32, #tpu.memory_space<vmem>>, vector<1x8xf32>
      tpu.vector_store %arg9[%c0_22, %c0_23], %58 {strides = array<i32>} : memref<1x8xf32, #tpu.memory_space<vmem>>, vector<1x8xf32>,
      %c0_24 = arith.constant 0 : index
      %c0_25 = arith.constant 0 : index
      %60 = vector.load %arg8[%c0_24, %c0_25] : memref<1x8xf32, #tpu.memory_space<vmem>>, vector<1x8xf32>
      tpu.vector_store %arg8[%c0_24, %c0_25], %48 {strides = array<i32>} : memref<1x8xf32, #tpu.memory_space<vmem>>, vector<1x8xf32>,
    } else {
    }
    %c0_i32_3 = arith.constant 0 : i32
    %8 = arith.cmpi eq, %arg1, %c0_i32_3 : i32
    %9 = arith.extui %8 : i1 to i32
    %c0_i32_4 = arith.constant 0 : i32
    %10 = arith.cmpi ne, %9, %c0_i32_4 : i32
    scf.if %10 {
      %c0 = arith.constant 0 : index
      %11 = memref.load %arg7[%c0] : memref<1xf32, #tpu.memory_space<smem>>
      %12 = vector.broadcast %11 : f32 to vector<1x8x128xf32>
      %c0_5 = arith.constant 0 : index
      %c0_6 = arith.constant 0 : index
      %c0_7 = arith.constant 0 : index
      %13 = vector.load %arg4[%c0_5, %c0_6, %c0_7] : memref<1x8x128xf32, #tpu.memory_space<vmem>>, vector<1x8x128xf32>
      tpu.vector_store %arg4[%c0_5, %c0_6, %c0_7], %12 {strides = array<i32>} : memref<1x8x128xf32, #tpu.memory_space<vmem>>, vector<1x8x128xf32>,
      %c0_8 = arith.constant 0 : index
      %c0_9 = arith.constant 0 : index
      %14 = vector.load %arg8[%c0_8, %c0_9] : memref<1x8xf32, #tpu.memory_space<vmem>>, vector<1x8xf32>
      %15 = vector.shape_cast %14 : vector<1x8xf32> to vector<1x1x8xf32>
      %c0_10 = arith.constant 0 : index
      %c0_11 = arith.constant 0 : index
      %c0_12 = arith.constant 0 : index
      %16 = vector.load %arg5[%c0_10, %c0_11, %c0_12] : memref<1x1x8xf32, #tpu.memory_space<vmem>>, vector<1x1x8xf32>
      tpu.vector_store %arg5[%c0_10, %c0_11, %c0_12], %15 {strides = array<i32>} : memref<1x1x8xf32, #tpu.memory_space<vmem>>, vector<1x1x8xf32>,
      %c0_13 = arith.constant 0 : index
      %c0_14 = arith.constant 0 : index
      %17 = vector.load %arg9[%c0_13, %c0_14] : memref<1x8xf32, #tpu.memory_space<vmem>>, vector<1x8xf32>
      %18 = vector.shape_cast %17 : vector<1x8xf32> to vector<1x1x8xf32>
      %c0_15 = arith.constant 0 : index
      %c0_16 = arith.constant 0 : index
      %c0_17 = arith.constant 0 : index
      %19 = vector.load %arg6[%c0_15, %c0_16, %c0_17] : memref<1x1x8xf32, #tpu.memory_space<vmem>>, vector<1x1x8xf32>
      tpu.vector_store %arg6[%c0_15, %c0_16, %c0_17], %18 {strides = array<i32>} : memref<1x1x8xf32, #tpu.memory_space<vmem>>, vector<1x1x8xf32>,
    } else {
    }
    return
  }
  func.func @transform_0(%arg0: i32, %arg1: i32) -> (i32, i32) {
    %c1_i32 = arith.constant 1 : i32
    %0 = arith.muli %arg0, %c1_i32 : i32
    %1 = arith.addi %0, %arg1 : i32
    %c0_i32 = arith.constant 0 : i32
    %2 = arith.minsi %1, %c0_i32 : i32
    %c0_i32_0 = arith.constant 0 : i32
    %c0_i32_1 = arith.constant 0 : i32
    return %2, %c0_i32_0 : i32, i32
  }
  func.func @transform_1(%arg0: i32, %arg1: i32) -> (i32, i32) {
    %c1_i32 = arith.constant 1 : i32
    %0 = arith.muli %arg0, %c1_i32 : i32
    %1 = arith.addi %0, %arg1 : i32
    %c0_i32 = arith.constant 0 : i32
    %2 = arith.minsi %1, %c0_i32 : i32
    %c0_i32_0 = arith.constant 0 : i32
    %c0_i32_1 = arith.constant 0 : i32
    return %2, %c0_i32_0 : i32, i32
  }
  func.func @transform_2(%arg0: i32, %arg1: i32) -> (i32, i32, i32) {
    %c0_i32 = arith.constant 0 : i32
    %c0_i32_0 = arith.constant 0 : i32
    %c0_i32_1 = arith.constant 0 : i32
    return %arg0, %c0_i32, %c0_i32_0 : i32, i32, i32
  }
  func.func @transform_3(%arg0: i32, %arg1: i32) -> (i32, i32, i32) {
    %c0_i32 = arith.constant 0 : i32
    %c0_i32_0 = arith.constant 0 : i32
    %c0_i32_1 = arith.constant 0 : i32
    return %arg0, %c0_i32, %c0_i32_0 : i32, i32, i32
  }
  func.func @transform_4(%arg0: i32, %arg1: i32) -> (i32, i32, i32) {
    %c0_i32 = arith.constant 0 : i32
    %c0_i32_0 = arith.constant 0 : i32
    %c0_i32_1 = arith.constant 0 : i32
    return %arg0, %c0_i32, %c0_i32_0 : i32, i32, i32
  }
}

</mosaic_0001>

<bundles_post_ra>
// kernel: tpu_custom_call.1
= control target key start
LH: loop header
LB: loop body
LE: loop exit
PB: predicated region body
PF: predicated region fallthrough
CT: control target
= control target key end

     0   :  { %s1265_s0 = inlined_call_operand.hbm [shape: f32[8,8], index: 0, kind: input, shape index: {}]   ;;  %s1266_s1 = inlined_call_operand.hbm [shape: f32[8,8], index: 1, kind: input, shape index: {}]   ;;  %s1267_s2 = inlined_call_operand.hbm [shape: f32[2,8,128], index: 2, kind: output, shape index: {0}]   ;;  %s1268_s3 = inlined_call_operand.hbm [shape: f32[2,1,8], index: 3, kind: output, shape index: {1}]   ;;  %s1269_s4 = inlined_call_operand.hbm [shape: f32[2,1,8], index: 4, kind: output, shape index: {2}]  }
   0x1   :  { %1274 = sst [smem:[#allocation18_spill]] %s1265_s0 }
   0x2   :  { %1275 = sst [smem:[#allocation19_spill]] %s1266_s1 }
   0x3   :  { %10 = vsyncpa [#allocation6], 0 }
   0x4   :  { %12 = vsyncpa [#allocation6 + $0x1], 0 }
   0x5   :  { %13 = vsyncpa [#allocation9], 0 }
   0x6   :  { %15 = vsyncpa [#allocation9 + $0x1], 0 }
   0x7   :  { %16 = vsyncpa [#allocation7], 0 }
   0x8   :  { %18 = vsyncpa [#allocation7 + $0x1], 0 }
   0x9   :  { %19 = vsyncpa [#allocation12], 0 }
   0xa   :  { %21 = vsyncpa [#allocation12 + $0x1], 0  ;;  %s994_s15 = smov 0   ;;  %s996_s16 = smov 0  }
   0xb   :  { %s998_s17 = smov 0   ;;  %s1000_s18 = smov 0  }
   0xc   :  { %s1002_s19 = smov 0   ;;  %s1004_s20 = smov 0  }
   0xd   :  { %s1006_s21 = smov 0   ;;  %s1008_s22 = smov 0  }
   0xe LB: > { %s1033_s23 = sadd.s32 4294967295, %s959_s22   ;;  %s1272_s24 = sadd.s32 4294967294, %s959_s22   ;;  %s959_s22 = sphi %s1008_s22, %s27_s22   ;;  %s955_s21 = sphi %s1006_s21, %s1298_s21   ;;  %s951_s20 = sphi %s1004_s20, %s1297_s20   ;;  %s947_s19 = sphi %s1002_s19, %s1255_s19   ;;  %s943_s18 = sphi %s1000_s18, %s1296_s18   ;;  %s939_s17 = sphi %s998_s17, %s1295_s17   ;;  %s935_s16 = sphi %s996_s16, %s1294_s16   ;;  %s931_s15 = sphi %s994_s15, %s1293_s15  }
   0xf   : > { %s39_s25 = sadd.s32 1, %s955_s21  ;;  %p928_p1 = scmp.ne.s32.totalorder %s947_s19, 0 }
  0x10   : > { %p41_p0 = scmp.ge.s32.totalorder %s39_s25, 2  ;;  %p60_p2 = scmp.eq.s32.totalorder %s959_s22, 0 }
  0x11   : > { %p65_p3 = scmp.ne.s32.totalorder %s947_s19, %s943_s18  ;;  %p66_p5 = scmp.eq.s32.totalorder %s1033_s23, 0 }
  0x12   : > { %s1300_s25 = smov (%p41_p0, %s39_s25), 0  ;;  %p1042_p4 = por %p928_p1, %p60_p2 }
  0x13   : > { %p1047_p6 = por %p66_p5, %p65_p3  ;;  %s107_s28 = ssub.s32 %s955_s21, %s1300_s25 }
  0x14   : > { %p108_p7 = scmp.eq.s32.totalorder %s107_s28, 0  ;;  %s110_s29 = sadd.s32 1, %s939_s17 }
  0x15   : > { %s1277_s27 = scalar_select %p1047_p6, 1, 0 }
  0x16   : > { %s1055_s30 = scalar_select %p108_p7, %s939_s17, %s110_s29  }
  0x17   : > { %p120_p8 = scmp.ne.s32.totalorder %s939_s17, %s935_s16  ;;  %p121_p9 = scmp.eq.s32.totalorder %s1033_s23, 1 }
  0x18   : > { %p126_p10 = scmp.ne.s32.totalorder %s935_s16, %s931_s15  ;;  %p127_p11 = scmp.eq.s32.totalorder %s1272_s24, 1 }
  0x19   : > { %p1064_p12 = por %p121_p9, %p120_p8  ;;  %p657_p1 = scmp.lt.s32.totalorder %s959_s22, 2 }
  0x1a   : > { %p1069_p0 = por %p127_p11, %p126_p10  ;;  %s961_s7 = smov [#allocation5]  }
  0x1b   : > { %s1278_s5 = scalar_select %p1064_p12, 1, 0 }
  0x1c   : > { %s1279_s6 = scalar_select %p1069_p0, 1, 0 }
  0x1d   : > { %s213_s8 = sshll.u32 %s961_s7, 4  ;;  %p1076_p2 = pnand %p657_p1, %p1042_p4  ;;  %s214_s8 = int_to_ptr.vmem [resolvable:$true] %s213_s8 }
  0x1e   : > { %s1281_s0 = sld [smem:[#allocation18_spill]] }
  0x1f   : > { %p744_p8 = pneg %p1076_p2 }
  0x24   : > { %s742_s12 = scalar_lea.hbm %s1281_s0, 128 }
  0x25   : > { %p743_p7 = scmp.ne.s32.totalorder %s1281_s0, %s742_s12  ;;  %p749_p10 = scmp.lt.s32.totalorder %s742_s12, %s742_s12 }
  0x27   : > { %p745_p4 = pnand %p744_p8, %p743_p7 }
  0x29   : > { %p746_p9 = pneg %p745_p4 }
  0x2b   : > { %p751_p11 = pnand %p749_p10, %p746_p9 }
  0x2d   : > { %754 = shalt.err (!%p751_p11)
}
  0x2e   : > { %s755_s18 = scalar_lea.vmem %s214_s8, 128  ;;  %s762_s26 = scalar_lea.vmem %s214_s8, 256 }
  0x2f   : > { %p756_p1 = scmp.ne.s32.totalorder %s214_s8, %s755_s18  ;;  %p763_p5 = scmp.lt.s32.totalorder %s214_s8, %s214_s8 }
  0x30   : > { %p764_p0 = scmp.lt.s32.totalorder %s762_s26, %s755_s18 }
  0x31   : > { %p758_p13 = pnand %p756_p1, %p744_p8 }
  0x32   : > { %p765_p12 = por %p764_p0, %p763_p5 }
  0x33   : > { %p759_p3 = pneg %p758_p13 }
  0x35   : > { %p766_p6 = pnand %p765_p12, %p759_p3 }
  0x37   : > { %769 = shalt.err (!%p766_p6)
}
  0x38   : > { %643 = dma.hbm_to_vmem [thread:$0]  (!%p1076_p2), %s1281_s0, 128, %s214_s8, [#allocation6]  }
  0x39   : > { %p1282_p7 = scmp.lt.s32.totalorder %s959_s22, 3  ;;  %p1283_p4 = scmp.ge.s32.totalorder %s959_s22, 1 }
  0x3a   : > { %s962_s10 = smov [#allocation8]   ;;  %s1285_s1 = sld [smem:[#allocation19_spill]] }
  0x3b   : > { %p1105_p9 = pnand %p1283_p4, %p1282_p7  ;;  %s234_s11 = sshll.u32 %s962_s10, 4  ;;  %s235_s11 = int_to_ptr.vmem [resolvable:$true] %s234_s11 }
  0x3d   : > { %s1284_s7 = scalar_select %p1105_p9, 1, 0 }
  0x40   : > { %s770_s14 = scalar_lea.hbm %s1285_s1, 128 }
  0x41   : > { %p771_p6 = scmp.ne.s32.totalorder %s1285_s1, %s770_s14  ;;  %p777_p0 = scmp.lt.s32.totalorder %s770_s14, %s770_s14 }
  0x43   : > { %p773_p12 = pnand %p771_p6, %p744_p8 }
  0x45   : > { %p774_p13 = pneg %p773_p12 }
  0x47   : > { %p779_p3 = pnand %p777_p0, %p774_p13 }
  0x49   : > { %782 = shalt.err (!%p779_p3)
}
  0x4a   : > { %s783_s8 = scalar_lea.vmem %s235_s11, 128  ;;  %s790_s28 = scalar_lea.vmem %s235_s11, 256 }
  0x4b   : > { %p784_p5 = scmp.ne.s32.totalorder %s235_s11, %s783_s8  ;;  %p791_p1 = scmp.lt.s32.totalorder %s235_s11, %s235_s11 }
  0x4c   : > { %p792_p7 = scmp.lt.s32.totalorder %s790_s28, %s783_s8 }
  0x4d   : > { %p786_p10 = pnand %p784_p5, %p744_p8 }
  0x4e   : > { %p793_p4 = por %p792_p7, %p791_p1 }
  0x4f   : > { %p787_p11 = pneg %p786_p10 }
  0x51   : > { %p794_p9 = pnand %p793_p4, %p787_p11 }
  0x53   : > { %797 = shalt.err (!%p794_p9)
}
  0x54   : > { %646 = dma.hbm_to_vmem [thread:$0]  (!%p1076_p2), %s1285_s1, 128, %s235_s11, [#allocation9]  }
  0x55   : > { %p1286_p6 = scmp.ne.s32.totalorder %s1284_s7, 0 }
  0x56   : > { %s245_s12 = sand.u32 (!%p1286_p6), 1, %s947_s19   ;;  %p1287_p8 = scmp.ne.s32.totalorder (!%p1286_p6), %s1277_s27, 0 }
  0x57   : > { %243 = sbr.rel (%p1286_p6) target bundleno = 702 (0x2be), region = 28  ;;  %s617_s13 = sshll.u32 (!%p1286_p6), %s245_s12, 3 }
  0x58   : > { %s246_s14 = scalar_lea.sflag (!%p1286_p6), [#allocation6], %s245_s12  ;;  %s249_s18 = scalar_lea.vmem (!%p1286_p6), [#allocation5], %s617_s13 }
  0x5c   : > { %913 = dma.done.wait (%p1287_p8), %s246_s14, 128  }
  0x5d   : > { %915 = vsyncadd (%p1287_p8), %s246_s14, 4294967168  ;;  %s255_s9 = scalar_lea.sflag [#allocation9], %s245_s12  ;;  %s258_s26 = scalar_lea.vmem [#allocation8], %s617_s13 }
  0x5e   : > { %917 = dma.done.wait (%p1287_p8), %s255_s9, 128  }
  0x5f   : > { %919 = vsyncadd (%p1287_p8), %s255_s9, 4294967168  ;;  %s1138_s7 = sand.u32 1, %s935_s16   ;;  %vm309_vm0 = vcmask 57344   ;;  %s963_s11 = smov 0.0   ;;  %v964_v0 = vmov -inf   ;;  %v965_v1 = vmov 0.0  }
  0x60   : > { %308 = sst [smem:[#allocation2]] %s963_s11  ;;  %s619_s8 = sshll.u32 %s1138_s7, 3  ;;  %310 = vst.msk [vmem:[#allocation3] sm:$0x1] %vm309_vm0, %v964_v0  ;;  %311 = vst.msk [vmem:[#allocation4] sm:$0x1] %vm309_vm0, %v965_v1 }
  0x61   : > { %s1143_s28 = scalar_lea.vmem [#allocation10], %s619_s8  ;;  %s289_s27 = scalar_lea.vmem [#allocation11], %s1138_s7 }
  0x62   : > { %s1273_s29 = scalar_lea.vmem [#allocation13], %s1138_s7  ;;  %p620_p2 = scmp.ge.s32.totalorder %s951_s20, 1 }
  0x63   : > { %s621_s10 = sshll.u32 (!%p620_p2), %s951_s20, 3  ;;  %s347_s12 = sld [smem:[#allocation2]] (!%p620_p2) }
  0x64   : > { %315 = sbr.rel (%p620_p2) target bundleno = 630 (0x276), region = 44 }
  0x69   : > { %v316_v2 = vld [vmem:[%s249_s18] sm:$0xff]  ;;  %v317_v3 = vld [vmem:[%s258_s26] sm:$0xff]  ;;  %vm329_vm1 = vcmask 64512   ;;  %v321_v15 = vlaneseq  ;;  %v325_v16 = vstv %s621_s10  ;;  %vm348_vm3 = vcmask 7168  }
  0x6a   : > { %v318_v4 = vsub.f32 %v316_v2, %v317_v3  ;;  %v362_v12 = vld [vmem:[#allocation3] sm:$0x1]  ;;  %v370_v34 = vld [vmem:[#allocation4] sm:$0x1] }
  0x6b   : > { %v322_v17 = vand.u32 127, %v321_v15  ;;  %v324_v18 = vshrl.u32 %v321_v15, 7 }
  0x6c   : > { %v319_v5 = vmul.f32 10.0, %v318_v4 }
  0x6d   : > { %v326_v19 = vadd.s32 %v325_v16, %v324_v18  ;;  %v378_v20 = vsub.s32 0, %v324_v18 }
  0x6e   : > { %v333_v6 = vsel %vm329_vm1, %v319_v5, -inf }
  0x6f   : > { %334 = vmax.xlane.f32.xlu0 %v333_v6  ;;  %v363_v7 = vrot.slane %v333_v6, 4  ;;  %vm327_vm2 = vcmp.eq.s32.totalorder %v322_v17, %v326_v19 }
  0x70   : > { %v328_v22 = vsel %vm327_vm2, %v319_v5, 0.0 }
  0x71   : > { %v364_v8 = vmax.f32 %v333_v6, %v363_v7  ;;  %v330_v23 = vsel %vm329_vm1, %v328_v22, 0.0 }
  0x72   : > { %331 = vadd.xlane.f32.xlu1 %v330_v23 }
  0x73   : > { %v365_v9 = vrot.slane %v364_v8, 2 }
  0x75   : > { %v366_v10 = vmax.f32 %v364_v8, %v365_v9 }
  0x77   : > { %v367_v11 = vrot.slane %v366_v10, 1 }
  0x79   : > { %v368_v13 = vmax.f32 %v366_v10, %v367_v11 }
  0x7b   : > { %v369_v14 = vmax.f32 %v362_v12, %v368_v13 }
  0x7d   : > { %394 = vst.msk [vmem:[#allocation3] sm:$0x1] %vm309_vm0, %v369_v14  ;;  %v379_v21 = vrot.slane %v369_v14, %v378_v20  ;;  %v371_v26 = vsub.f32 %v362_v12, %v369_v14 }
  0x7f   : > { %v381_v24 = vsub.f32 %v319_v5, %v379_v21  ;;  %v372_v27 = vmul.f32 1.442695, %v371_v26 }
  0x81   : > { %v382_v25 = vmul.f32 1.442695, %v381_v24 }
  0x83   : > { %734 = vpow2.f32 %v382_v25 }
  0x84   : > { %736 = vpow2.f32 %v372_v27 }
  0x90   : > { %v735_v28 = vpop.eup %734 }
  0x91   : > { %v384_v29 = vsel %vm329_vm1, %v735_v28, 0.0  ;;  %v737_v33 = vpop.eup %736 }
  0x92   : > { %v385_v30 = vrot.slane %v384_v29, 4  ;;  %v374_v36 = vmul.f32 %v737_v33, %v370_v34 }
  0x94   : > { %v386_v31 = vadd.f32 %v385_v30, %v384_v29 }
  0x96   : > { %v387_v32 = vrot.slane %v386_v31, 2 }
  0x98   : > { %v388_v35 = vadd.f32 %v387_v32, %v386_v31 }
  0x9a   : > { %v389_v37 = vrot.slane %v388_v35, 1 }
  0x9c   : > { %v390_v38 = vadd.f32 %v389_v37, %v388_v35 }
  0x9e   : > { %v391_v39 = vadd.f32 %v390_v38, %v374_v36 }
  0xa0   : > { %393 = vst.msk [vmem:[#allocation4] sm:$0x1] %vm309_vm0, %v391_v39 }
  0xf8   : > { %v335_v40 = vpop.xlane.xlu0 %334 }
  0xf9   : > { %v336_v41 = vsub.f32 %v319_v5, %v335_v40 }
  0xfb   : > { %v337_v42 = vmul.f32 1.442695, %v336_v41  ;;  %v332_v46 = vpop.xlane.xlu1 %331 }
  0xfc   : > { %v345_v49 = vmul.f32 2.0, %v332_v46 }
  0xfd   : > { %738 = vpow2.f32 %v337_v42 }
 0x10a   : > { %v739_v43 = vpop.eup %738 }
 0x10b   : > { %v339_v44 = vsel %vm329_vm1, %v739_v43, 0.0 }
 0x10c   : > { %340 = vadd.xlane.f32.xlu0 %v339_v44 }
 0x195   : > { %v341_v45 = vpop.xlane.xlu0 %340 }
 0x196   : > { %740 = vlog2.f32 %v341_v45 }
 0x1a3   : > { %v741_v47 = vpop.eup %740 }
 0x1a4   : > { %v343_v48 = vmul.f32 0.6931472, %v741_v47 }
 0x1a6   : > { %v344_v50 = vadd.f32 %v343_v48, %v335_v40 }
 0x1a8   : > { %v346_v51 = vsub.f32 %v345_v49, %v344_v50 }
 0x1aa   : > { %v349_v52 = vsel %vm348_vm3, %v346_v51, 0.0 }
 0x1ab   : > { %350 = vadd.xlane.f32.xlu1 %v349_v52 }
 0x234   : > { %v351_v53 = vpop.xlane.xlu1 %350 }
 0x235   : > { %v352_v54 = vrot.slane %v351_v53, 4 }
 0x237   : > { %v353_v55 = vadd.f32 %v352_v54, %v351_v53 }
 0x239   : > { %v354_v56 = vrot.slane %v353_v55, 2 }
 0x23b   : > { %v355_v57 = vadd.f32 %v354_v56, %v353_v55 }
 0x23d   : > { %v356_v58 = vrot.slane %v355_v57, 1 }
 0x23f   : > { %v357_v59 = vadd.f32 %v356_v58, %v355_v57 }
 0x241   : > { %628 = vpush %v357_v59 }
 0x272   : > { %s629_s13 = spop %628 }
 0x273   : > { %s359_s14 = sadd.f32 %s629_s13, %s347_s12 }
 0x275   : > { %361 = sst [smem:[#allocation2]] %s359_s14 }
 0x276 PF: > { %v401_v60 = vld [vmem:[#allocation3] sm:$0x1]  ;;  %s1155_s18 = sld [smem:[#allocation2]]  ;;  %v404_v61 = vld [vmem:[#allocation4] sm:$0x1]  ;;  %s411_s9 = sand.u32 1, %s1033_s23  }
 0x277   : > { %403 = vst.msk [vmem:[%s289_s27] sm:$0x1] %vm309_vm0, %v401_v60  ;;  %405 = vst.msk [vmem:[%s1273_s29] sm:$0x1] %vm309_vm0, %v404_v61  ;;  %s624_s26 = sshll.u32 %s951_s20, 4  ;;  %s441_s12 = sshll.u32 %s289_s27, 4  ;;  %s442_s12 = int_to_ptr.vmem [resolvable:$true] %s441_s12 }
 0x278   : > { %s1168_s10 = scalar_lea.hbm %s1268_s3, %s624_s26  ;;  %s1175_s24 = scalar_lea.hbm %s1269_s4, %s624_s26 }
 0x279   : > { %s1177_s0 = scalar_lea.sflag [#allocation12], %s411_s9  ;;  %s798_s1 = scalar_lea.vmem %s442_s12, 16 }
 0x27a   : > { %p799_p9 = scmp.ne.s32.totalorder %s442_s12, %s798_s1  ;;  %p1288_p12 = scmp.ne.s32.totalorder %s1278_s5, 0 }
 0x27b   : > { %s966_s23 = smov [#allocation11]  }
 0x27c   : > { %p800_p13 = pnand %p799_p9, %p1288_p12  ;;  %s802_s29 = sshll.u32 %s966_s23, 4  ;;  %s803_s29 = int_to_ptr.vmem [resolvable:$false] %s802_s29 }
 0x27d   : > { %s804_s11 = scalar_lea.vmem %s803_s29, 32  ;;  %p805_p3 = scmp.lt.s32.totalorder %s442_s12, %s803_s29 }
 0x27e   : > { %p801_p0 = pneg %p800_p13  ;;  %p806_p5 = scmp.lt.s32.totalorder %s804_s11, %s798_s1 }
 0x280   : > { %p807_p10 = por %p806_p5, %p805_p3 }
 0x282   : > { %p808_p11 = pnand %p807_p10, %p801_p0 }
 0x284   : > { %811 = shalt.err (!%p808_p11)
}
 0x285   : > { %s812_s27 = scalar_lea.hbm %s1168_s10, 16  ;;  %s816_s8 = scalar_lea.hbm %s1268_s3, 32 }
 0x286   : > { %p813_p1 = scmp.ne.s32.totalorder %s1168_s10, %s812_s27  ;;  %p817_p6 = scmp.lt.s32.totalorder %s1168_s10, %s1268_s3 }
 0x287   : > { %p818_p8 = scmp.lt.s32.totalorder %s816_s8, %s812_s27 }
 0x288   : > { %p814_p7 = pnand %p813_p1, %p1288_p12 }
 0x289   : > { %p819_p2 = por %p818_p8, %p817_p6 }
 0x28a   : > { %p815_p4 = pneg %p814_p7 }
 0x28c   : > { %p820_p9 = pnand %p819_p2, %p815_p4 }
 0x28e   : > { %823 = shalt.err (!%p820_p9)
}
 0x28f   : > { %635 = dma.vmem_to_hbm [thread:$0]  (%p1288_p12), %s442_s12, 16, %s1168_s10, %s1177_s0   ;;  %v399_v62 = vstv %s1155_s18 }
 0x290   : > { %s623_s1 = sshll.u32 %s951_s20, 7  ;;  %s428_s29 = sshll.u32 %s1143_s28, 4  ;;  %400 = vst [vmem:[%s1143_s28] sm:$0xff] %v399_v62  ;;  %s429_s29 = int_to_ptr.vmem [resolvable:$true] %s428_s29 }
 0x291   : > { %s426_s27 = scalar_lea.hbm %s1267_s2, %s623_s1  ;;  %s407_s9 = scalar_lea.sflag [#allocation7], %s1138_s7 }
 0x292   : > { %s824_s26 = scalar_lea.vmem %s429_s29, 128  ;;  %s967_s8 = smov [#allocation10]  }
 0x293   : > { %p825_p13 = scmp.ne.s32.totalorder %s429_s29, %s824_s26  ;;  %s828_s13 = sshll.u32 %s967_s8, 4  ;;  %s829_s13 = int_to_ptr.vmem [resolvable:$false] %s828_s13 }
 0x294   : > { %s830_s14 = scalar_lea.vmem %s829_s13, 256  ;;  %p831_p5 = scmp.lt.s32.totalorder %s429_s29, %s829_s13 }
 0x295   : > { %p826_p0 = pnand %p825_p13, %p1288_p12  ;;  %p832_p10 = scmp.lt.s32.totalorder %s830_s14, %s824_s26 }
 0x297   : > { %p827_p3 = pneg %p826_p0  ;;  %p833_p11 = por %p832_p10, %p831_p5 }
 0x299   : > { %p834_p1 = pnand %p833_p11, %p827_p3 }
 0x29b   : > { %837 = shalt.err (!%p834_p1)
}
 0x29c   : > { %s838_s20 = scalar_lea.hbm %s426_s27, 128  ;;  %s842_s10 = scalar_lea.hbm %s1267_s2, 256 }
 0x29d   : > { %p839_p7 = scmp.ne.s32.totalorder %s426_s27, %s838_s20  ;;  %p843_p8 = scmp.lt.s32.totalorder %s426_s27, %s1267_s2 }
 0x29e   : > { %p844_p2 = scmp.lt.s32.totalorder %s842_s10, %s838_s20 }
 0x29f   : > { %p840_p4 = pnand %p839_p7, %p1288_p12 }
 0x2a0   : > { %p845_p9 = por %p844_p2, %p843_p8 }
 0x2a1   : > { %p841_p6 = pneg %p840_p4 }
 0x2a3   : > { %p846_p13 = pnand %p845_p9, %p841_p6 }
 0x2a5   : > { %849 = shalt.err (!%p846_p13)
}
 0x2a6   : > { %634 = dma.vmem_to_hbm [thread:$0]  (%p1288_p12), %s429_s29, 128, %s426_s27, %s407_s9  }
 0x2a7   : > { %s1289_s23 = scalar_lea.vmem [#allocation13], %s1138_s7  ;;  %s968_s8 = smov [#allocation13]  }
 0x2a8   : > { %s454_s11 = sshll.u32 %s1289_s23, 4  ;;  %s854_s13 = sshll.u32 %s968_s8, 4  ;;  %s455_s11 = int_to_ptr.vmem [resolvable:$true] %s454_s11  ;;  %s855_s13 = int_to_ptr.vmem [resolvable:$false] %s854_s13 }
 0x2a9   : > { %s850_s26 = scalar_lea.vmem %s455_s11, 16  ;;  %s856_s14 = scalar_lea.vmem %s855_s13, 32 }
 0x2aa   : > { %p851_p0 = scmp.ne.s32.totalorder %s455_s11, %s850_s26  ;;  %p857_p10 = scmp.lt.s32.totalorder %s455_s11, %s855_s13 }
 0x2ab   : > { %p858_p11 = scmp.lt.s32.totalorder %s856_s14, %s850_s26 }
 0x2ac   : > { %p852_p3 = pnand %p851_p0, %p1288_p12 }
 0x2ad   : > { %p859_p1 = por %p858_p11, %p857_p10 }
 0x2ae   : > { %p853_p5 = pneg %p852_p3 }
 0x2b0   : > { %p860_p7 = pnand %p859_p1, %p853_p5 }
 0x2b2   : > { %863 = shalt.err (!%p860_p7)
}
 0x2b3   : > { %s864_s7 = scalar_lea.hbm %s1175_s24, 16  ;;  %s868_s9 = scalar_lea.hbm %s1269_s4, 32 }
 0x2b4   : > { %p865_p4 = scmp.ne.s32.totalorder %s1175_s24, %s864_s7  ;;  %p869_p2 = scmp.lt.s32.totalorder %s1175_s24, %s1269_s4 }
 0x2b5   : > { %p870_p9 = scmp.lt.s32.totalorder %s868_s9, %s864_s7 }
 0x2b6   : > { %p866_p6 = pnand %p865_p4, %p1288_p12 }
 0x2b7   : > { %p871_p13 = por %p870_p9, %p869_p2 }
 0x2b8   : > { %p867_p8 = pneg %p866_p6 }
 0x2ba   : > { %p872_p0 = pnand %p871_p13, %p867_p8 }
 0x2bc   : > { %875 = shalt.err (!%p872_p0)
}
 0x2bd   : > { %636 = dma.vmem_to_hbm [thread:$0]  (%p1288_p12), %s455_s11, 16, %s1175_s24, %s1177_s0  }
 0x2be PF: > { %s466_s18 = sand.u32 1, %s931_s15   ;;  %p1290_p3 = scmp.ne.s32.totalorder %s1279_s6, 0 }
 0x2bf   : > { %p1291_p5 = scmp.ge.s32.totalorder %s959_s22, 2  ;;  %s467_s10 = scalar_lea.sflag [#allocation7], %s466_s18 }
 0x2c1   : > { %p648_p10 = pnand %p1291_p5, %p1290_p3 }
 0x2c3   : > { %p649_p11 = pneg %p648_p10 }
 0x2c5   : > { %921 = dma.done.wait (%p649_p11), %s467_s10, 128  }
 0x2c6   : > { %923 = vsyncadd (%p649_p11), %s467_s10, 4294967168  ;;  %s1292_s12 = sadd.s32 4294967294, %s959_s22  }
 0x2c7   : > { %s475_s1 = sand.u32 1, %s1292_s12  }
 0x2c8   : > { %s476_s23 = scalar_lea.sflag [#allocation12], %s475_s1 }
 0x2c9   : > { %925 = dma.done.wait (%p649_p11), %s476_s23, 32  }
 0x2ca   : > { %927 = vsyncadd (%p649_p11), %s476_s23, 4294967264  ;;  %s27_s22 = sadd.s32 1, %s959_s22   ;;  %s1293_s15 = smov %s935_s16 }
 0x2cb   : > { %p24_p12 = scmp.ge.s32.totalorder %s27_s22, 4   ;;  %s1294_s16 = smov %s939_s17 }
 0x2cc   : > { %s1295_s17 = smov %s1055_s30  ;;  %s1296_s18 = smov %s947_s19 }
 0x2cd   : > { %s1255_s19 = smov 0   ;;  %s1297_s20 = smov %s955_s21 }
 0x2ce   : > { %s1298_s21 = smov %s1300_s25  ;;  %26 = sbr.rel (!%p24_p12) target bundleno = 14 (0xe), region = 132 }
 0x2d3   :  { %488 = vsyncpa [#allocation6], 1 }
 0x2d4   :  { %490 = vsyncpa [#allocation6 + $0x1], 1 }
 0x2d5   :  { %491 = vsyncpa [#allocation9], 1 }
 0x2d6   :  { %493 = vsyncpa [#allocation9 + $0x1], 1 }
 0x2d7   :  { %494 = vsyncpa [#allocation7], 1 }
 0x2d8   :  { %496 = vsyncpa [#allocation7 + $0x1], 1 }
 0x2d9   :  { %497 = vsyncpa [#allocation12], 1 }
 0x2da   :  { %499 = vsyncpa [#allocation12 + $0x1], 1 }

</bundles_post_ra>
